<compile_context>
chip_gen: v5e
topology: v5e:2x2
jax: 0.10.0
libtpu: 0.0.40
codegen_flags: <defaults>
</compile_context>

<pallas_src>
import functools

import jax
import jax.numpy as jnp
from jax import lax
from jax.experimental import pallas as pl
from jax.experimental.pallas import tpu as pltpu

_LANE = 128
_SUBLANE = 8


def _round_up(v, m):
    return (v + m - 1) // m * m


def _fusion_branch_kernel(x_ref, w1_ref, w2_ref, b2_ref, out_ref, acc_ref, *,
                          inv_hw, ns, last_valid, thw):
    # x_ref  : (TB, C, THW)    streamed spatial tile of x (NCHW, spatial flat)
    # w1_ref : (Hdp, C)        fc1 weight, zero-padded along Hd
    # w2_ref : (2, Hdp, Cpad)  fc2 weight per softmax slot (even/odd out-chs)
    # b2_ref : (2, Cpad)       fc2 bias per softmax slot
    # out_ref: (2, TB, Cpad)   softmax probabilities, lane-dense in C
    # acc_ref: (TB, C) f32     running spatial sum, persists over spatial axis
    s = pl.program_id(1)

    @pl.when(s == 0)
    def _init():
        acc_ref[...] = jnp.zeros_like(acc_ref)

    def _accumulate(mask_tail):
        xt = x_ref[...].astype(jnp.float32)                       # (TB, C, THW)
        if mask_tail:
            # Final spatial step is partial: zero the stale tail of the tile.
            pos = lax.broadcasted_iota(jnp.int32, xt.shape, 2)
            xt = jnp.where(pos < last_valid, xt, 0.0)
        acc_ref[...] += jnp.sum(xt, axis=2)

    if last_valid == thw:
        # Spatial extent divides the tile size: every step is a full tile.
        _accumulate(False)
    else:
        @pl.when(s < ns - 1)
        def _full_steps():
            _accumulate(False)

        @pl.when(s == ns - 1)
        def _tail_step():
            _accumulate(True)

    @pl.when(s == ns - 1)
    def _finalize():
        # Divide by the TRUE H*W (masked tail never perturbs the mean).
        pooled = acc_ref[...] * inv_hw                             # (TB, C)

        # fc1 (1x1 conv, no bias) + ReLU on the VPU: Hd is tiny, skip the MXU.
        w1 = w1_ref[...]                                           # (Hdp, C)
        h = jnp.sum(pooled[:, None, :] * w1[None, :, :], axis=-1)  # (TB, Hdp)
        h = jnp.maximum(h, 0.0)

        # fc2 (1x1 conv, bias), one matmul per softmax slot, lane-dense in C.
        b2 = b2_ref[...]                                           # (2, Cpad)
        y0 = jnp.dot(h, w2_ref[0], preferred_element_type=jnp.float32) + b2[0:1, :]
        y1 = jnp.dot(h, w2_ref[1], preferred_element_type=jnp.float32) + b2[1:2, :]

        # Softmax over the 2 slots (per batch, per channel).
        m = jnp.maximum(y0, y1)
        e0 = jnp.exp(y0 - m)
        e1 = jnp.exp(y1 - m)
        inv = 1.0 / (e0 + e1)

        # Two full-width, unmasked, lane-dense stores (slot-major layout).
        out_ref[0] = (e0 * inv).astype(out_ref.dtype)
        out_ref[1] = (e1 * inv).astype(out_ref.dtype)


def fusion_branch(x, w1, w2, b2, *, tb=None, thw=None):
    """x: (B, C, H, W).  w1: (Hd, C, 1, 1).  w2: (2C, Hd, 1, 1).  b2: (2C,)."""
    B, C, H, W = x.shape
    Hd = w1.shape[0]
    HW = H * W
    itemsize = jnp.dtype(x.dtype).itemsize

    Cpad = _round_up(C, _LANE)       # lane-dense epilogue / output
    Hdp = _round_up(Hd, _SUBLANE)    # sublane-friendly hidden dim

    # ---- batch tiling (output block puts TB on the sublane axis) -----------
    if tb is None:
        tb = B if B <= _SUBLANE else _SUBLANE
    tb = min(int(tb), B)
    if tb != B and tb % _SUBLANE != 0:
        tb = B if B <= _SUBLANE else _SUBLANE
    nb = pl.cdiv(B, tb)

    # ---- spatial tiling (the streamed axis): lane-dense or the full extent -
    if thw is None:
        budget = 6 * 1024 * 1024     # per x buffer; Pallas double-buffers it
        thw = max(_LANE, budget // max(1, tb * C * itemsize))
    thw = int(min(thw, HW))
    if thw < HW:
        thw = max(_LANE, (thw // _LANE) * _LANE)
        if thw >= HW:
            thw = HW
    ns = pl.cdiv(HW, thw)
    last_valid = HW - (ns - 1) * thw     # valid lanes in the final spatial step

    # ---- input stays in its natural NCHW-contiguous layout (no pad/copy) ---
    x3 = x.reshape(B, C, HW)

    # ---- 1x1-conv weights -> small padded matmul operands (f32) ------------
    w1_mat = w1.reshape(Hd, C).astype(jnp.float32)
    w1_k = jnp.zeros((Hdp, C), jnp.float32).at[:Hd, :].set(w1_mat)

    # PyTorch .view(B, C, 2) pairs output channels (2c, 2c+1) -> even/odd split
    w2_mat = w2.reshape(2 * C, Hd).astype(jnp.float32)
    w2_k = jnp.zeros((2, Hdp, Cpad), jnp.float32)
    w2_k = w2_k.at[0, :Hd, :C].set(w2_mat[0::2].T)
    w2_k = w2_k.at[1, :Hd, :C].set(w2_mat[1::2].T)

    b2_k = jnp.zeros((2, Cpad), jnp.float32)
    b2_k = b2_k.at[0, :C].set(b2[0::2].astype(jnp.float32))
    b2_k = b2_k.at[1, :C].set(b2[1::2].astype(jnp.float32))

    cost = pl.CostEstimate(
        flops=int(B * C * HW + 2 * B * C * Hd + 4 * B * Hd * Cpad + 10 * B * C),
        transcendentals=int(2 * B * C),
        bytes_accessed=int(x3.size * itemsize
                           + (w1_k.size + w2_k.size + b2_k.size) * 4
                           + 2 * B * Cpad * 4),
    )

    kernel = functools.partial(
        _fusion_branch_kernel,
        inv_hw=1.0 / float(HW), ns=int(ns), last_valid=int(last_valid),
        thw=int(thw))

    out = pl.pallas_call(
        kernel,
        out_shape=jax.ShapeDtypeStruct((2, B, Cpad), jnp.float32),
        grid=(nb, ns),
        in_specs=[
            # streamed input tile (double-buffered by the Pallas pipeline)
            pl.BlockSpec((tb, C, thw), lambda b, s: (b, 0, s)),
            # weights/bias stay resident (constant index maps -> no re-DMA)
            pl.BlockSpec((Hdp, C), lambda b, s: (0, 0)),
            pl.BlockSpec((2, Hdp, Cpad), lambda b, s: (0, 0, 0)),
            pl.BlockSpec((2, Cpad), lambda b, s: (0, 0)),
        ],
        # output block constant along the spatial (reduction) axis; written
        # only at the last spatial step.
        out_specs=pl.BlockSpec((2, tb, Cpad), lambda b, s: (0, b, 0)),
        scratch_shapes=[pltpu.VMEM((tb, C), jnp.float32)],
        compiler_params=pltpu.CompilerParams(
            dimension_semantics=("parallel", "arbitrary"),
            vmem_limit_bytes=32 * 1024 * 1024,
        ),
        cost_estimate=cost,
    )(x3, w1_k, w2_k, b2_k)

    # Slice away channel padding and go back to the PyTorch layout (B, C, 2).
    probs = out[:, :B, :C]                      # (2, B, C)
    return jnp.transpose(probs, (1, 2, 0))      # (B, C, 2)


def _reference(x, w1, w2, b2):
    B, C = x.shape[0], x.shape[1]
    Hd = w1.shape[0]
    pooled = jnp.mean(x, axis=(2, 3))                                 # (B, C)
    h = jnp.maximum(pooled @ w1.reshape(Hd, C).T, 0.0)                # (B, Hd)
    logits = (h @ w2.reshape(2 * C, Hd).T + b2).reshape(B, C, 2)
    return jax.nn.softmax(logits, axis=2)


if __name__ == "__main__":
    ratios = 1.0 / 8

    # ---- main test: B=2, C=4, 16x16 spatial --------------------------------
    B, C, H, W = 2, 4, 16, 16
    Hd = int(C * ratios) + 1            # = 1
    out_planes = 2 * C                  # = 8

    key = jax.random.PRNGKey(0)
    kx, k1, k2, kb = jax.random.split(key, 4)
    x = jax.random.normal(kx, (B, C, H, W), dtype=jnp.float32)
    w1 = jax.random.normal(k1, (Hd, C, 1, 1), dtype=jnp.float32) * 0.1
    w2 = jax.random.normal(k2, (out_planes, Hd, 1, 1), dtype=jnp.float32) * 0.1
    b2 = jax.random.normal(kb, (out_planes,), dtype=jnp.float32) * 0.1

    # thw=128 -> two full spatial grid steps, exercising the streaming accumulator.
    y = fusion_branch(x, w1, w2, b2, thw=128)
    jax.block_until_ready(y)
    ref = _reference(x, w1, w2, b2)
    assert y.shape == (B, C, 2)
    assert jnp.allclose(y, ref, atol=1e-5, rtol=1e-5), float(jnp.max(jnp.abs(y - ref)))

    # ---- robustness test: non-divisible spatial extent + partial batch tile -
    B2, C2, H2, W2 = 9, 4, 13, 13       # HW=169 -> masked tail step; B=9 -> edge block
    Hd2 = int(C2 * ratios) + 1
    kx2, k12, k22, kb2 = jax.random.split(jax.random.PRNGKey(0), 4)
    x2 = jax.random.normal(kx2, (B2, C2, H2, W2), dtype=jnp.float32)
    w12 = jax.random.normal(k12, (Hd2, C2, 1, 1), dtype=jnp.float32) * 0.1
    w22 = jax.random.normal(k22, (2 * C2, Hd2, 1, 1), dtype=jnp.float32) * 0.1
    b22 = jax.random.normal(kb2, (2 * C2,), dtype=jnp.float32) * 0.1

    y2 = fusion_branch(x2, w12, w22, b22, thw=128)
    jax.block_until_ready(y2)
    ref2 = _reference(x2, w12, w22, b22)
    assert y2.shape == (B2, C2, 2)
    assert jnp.allclose(y2, ref2, atol=1e-5, rtol=1e-5), float(jnp.max(jnp.abs(y2 - ref2)))

    print("KERNEL_OK")
</pallas_src>

<mosaic_0001>
module attributes {stable_mosaic.version = 11 : i64} {
  func.func @_fusion_branch_kernel(%arg0: i32, %arg1: i32, %arg2: memref<2x4x128xf32, #tpu.memory_space<vmem>>, %arg3: memref<8x4xf32, #tpu.memory_space<vmem>>, %arg4: memref<2x8x128xf32, #tpu.memory_space<vmem>>, %arg5: memref<2x128xf32, #tpu.memory_space<vmem>>, %arg6: memref<2x2x128xf32, #tpu.memory_space<vmem>>, %arg7: memref<2x4xf32, #tpu.memory_space<vmem>>) attributes {dimension_semantics = [#tpu.dimension_semantics<parallel>, #tpu.dimension_semantics<arbitrary>], iteration_bounds = array<i64: 1, 2>, scalar_prefetch = 0 : i64, scratch_operands = 1 : i64, tpu.core_type = #tpu.core_type<tc>, window_params = [{transform_indices = @transform_0, window_bounds = array<i64: 2, 4, 128>}, {pipeline_mode = #tpu.pipeline_mode<synchronous>, transform_indices = @transform_1, window_bounds = array<i64: 8, 4>}, {pipeline_mode = #tpu.pipeline_mode<synchronous>, transform_indices = @transform_2, window_bounds = array<i64: 2, 8, 128>}, {pipeline_mode = #tpu.pipeline_mode<synchronous>, transform_indices = @transform_3, window_bounds = array<i64: 2, 128>}, {transform_indices = @transform_4, window_bounds = array<i64: 2, 2, 128>}]} {
    %c0_i32 = arith.constant 0 : i32
    %0 = arith.cmpi eq, %arg1, %c0_i32 : i32
    %1 = arith.extui %0 : i1 to i32
    %c0_i32_0 = arith.constant 0 : i32
    %2 = arith.cmpi ne, %1, %c0_i32_0 : i32
    scf.if %2 {
      %cst_8 = arith.constant 0.000000e+00 : f32
      %11 = vector.broadcast %cst_8 : f32 to vector<2x4xf32>
      %c0_9 = arith.constant 0 : index
      %c0_10 = arith.constant 0 : index
      %12 = vector.load %arg7[%c0_9, %c0_10] : memref<2x4xf32, #tpu.memory_space<vmem>>, vector<2x4xf32>
      tpu.vector_store %arg7[%c0_9, %c0_10], %11 {strides = array<i32>} : memref<2x4xf32, #tpu.memory_space<vmem>>, vector<2x4xf32>,
    } else {
    }
    %c0 = arith.constant 0 : index
    %c0_1 = arith.constant 0 : index
    %c0_2 = arith.constant 0 : index
    %3 = vector.load %arg2[%c0, %c0_1, %c0_2] : memref<2x4x128xf32, #tpu.memory_space<vmem>>, vector<2x4x128xf32>
    %c0_3 = arith.constant 0 : index
    %c0_4 = arith.constant 0 : index
    %4 = vector.load %arg7[%c0_3, %c0_4] : memref<2x4xf32, #tpu.memory_space<vmem>>, vector<2x4xf32>
    %cst = arith.constant dense<0.000000e+00> : vector<2x4xf32>
    %5 = vector.multi_reduction <add>, %3, %cst [2] : vector<2x4x128xf32> to vector<2x4xf32>
    %6 = arith.addf %4, %5 : vector<2x4xf32>
    %c0_5 = arith.constant 0 : index
    %c0_6 = arith.constant 0 : index
    %7 = vector.load %arg7[%c0_5, %c0_6] : memref<2x4xf32, #tpu.memory_space<vmem>>, vector<2x4xf32>
    tpu.vector_store %arg7[%c0_5, %c0_6], %6 {strides = array<i32>} : memref<2x4xf32, #tpu.memory_space<vmem>>, vector<2x4xf32>,
    %c1_i32 = arith.constant 1 : i32
    %8 = arith.cmpi eq, %arg1, %c1_i32 : i32
    %9 = arith.extui %8 : i1 to i32
    %c0_i32_7 = arith.constant 0 : i32
    %10 = arith.cmpi ne, %9, %c0_i32_7 : i32
    scf.if %10 {
      %c0_8 = arith.constant 0 : index
      %c0_9 = arith.constant 0 : index
      %11 = vector.load %arg7[%c0_8, %c0_9] : memref<2x4xf32, #tpu.memory_space<vmem>>, vector<2x4xf32>
      %cst_10 = arith.constant 3.906250e-03 : f32
      %12 = vector.broadcast %cst_10 : f32 to vector<2x4xf32>
      %13 = arith.mulf %11, %12 : vector<2x4xf32>
      %c0_11 = arith.constant 0 : index
      %c0_12 = arith.constant 0 : index
      %14 = vector.load %arg3[%c0_11, %c0_12] : memref<8x4xf32, #tpu.memory_space<vmem>>, vector<8x4xf32>
      %15 = vector.shape_cast %13 : vector<2x4xf32> to vector<2x1x4xf32>
      %16 = vector.shape_cast %14 : vector<8x4xf32> to vector<1x8x4xf32>
      %17 = vector.broadcast %15 : vector<2x1x4xf32> to vector<2x8x4xf32>
      %18 = vector.broadcast %16 : vector<1x8x4xf32> to vector<2x8x4xf32>
      %19 = arith.mulf %17, %18 : vector<2x8x4xf32>
      %cst_13 = arith.constant dense<0.000000e+00> : vector<2x8xf32>
      %20 = vector.multi_reduction <add>, %19, %cst_13 [2] : vector<2x8x4xf32> to vector<2x8xf32>
      %cst_14 = arith.constant 0.000000e+00 : f32
      %21 = vector.broadcast %cst_14 : f32 to vector<2x8xf32>
      %22 = arith.maximumf %20, %21 : vector<2x8xf32>
      %c0_15 = arith.constant 0 : index
      %c0_16 = arith.constant 0 : index
      %23 = vector.load %arg5[%c0_15, %c0_16] : memref<2x128xf32, #tpu.memory_space<vmem>>, vector<2x128xf32>
      %c0_17 = arith.constant 0 : index
      %c0_18 = arith.constant 0 : index
      %c0_19 = arith.constant 0 : index
      %24 = vector.load %arg4[%c0_17, %c0_18, %c0_19] : memref<2x8x128xf32, #tpu.memory_space<vmem>>, vector<1x8x128xf32>
      %25 = vector.shape_cast %24 : vector<1x8x128xf32> to vector<8x128xf32>
      %cst_20 = arith.constant dense<0.000000e+00> : vector<2x128xf32>
      %26 = tpu.matmul %22, %25, %cst_20 {dimension_numbers = #tpu.dot_dimension_numbers<[1], [0], [0], [1], [0, 0, 1, 1], [], []>} : vector<2x8xf32>, vector<8x128xf32>, vector<2x128xf32> -> vector<2x128xf32>
      %27 = vector.extract_strided_slice %23 {offsets = [0, 0], sizes = [1, 128], strides = [1, 1]} : vector<2x128xf32> to vector<1x128xf32>
      %28 = vector.broadcast %27 : vector<1x128xf32> to vector<2x128xf32>
      %29 = arith.addf %26, %28 : vector<2x128xf32>
      %c1 = arith.constant 1 : index
      %c0_21 = arith.constant 0 : index
      %c0_22 = arith.constant 0 : index
      %30 = vector.load %arg4[%c1, %c0_21, %c0_22] : memref<2x8x128xf32, #tpu.memory_space<vmem>>, vector<1x8x128xf32>
      %31 = vector.shape_cast %30 : vector<1x8x128xf32> to vector<8x128xf32>
      %cst_23 = arith.constant dense<0.000000e+00> : vector<2x128xf32>
      %32 = tpu.matmul %22, %31, %cst_23 {dimension_numbers = #tpu.dot_dimension_numbers<[1], [0], [0], [1], [0, 0, 1, 1], [], []>} : vector<2x8xf32>, vector<8x128xf32>, vector<2x128xf32> -> vector<2x128xf32>
      %33 = vector.extract_strided_slice %23 {offsets = [1, 0], sizes = [1, 128], strides = [1, 1]} : vector<2x128xf32> to vector<1x128xf32>
      %34 = vector.broadcast %33 : vector<1x128xf32> to vector<2x128xf32>
      %35 = arith.addf %32, %34 : vector<2x128xf32>
      %36 = arith.maximumf %29, %35 : vector<2x128xf32>
      %37 = arith.subf %29, %36 : vector<2x128xf32>
      %38 = math.exp %37 : vector<2x128xf32>
      %39 = arith.subf %35, %36 : vector<2x128xf32>
      %40 = math.exp %39 : vector<2x128xf32>
      %41 = arith.addf %38, %40 : vector<2x128xf32>
      %cst_24 = arith.constant 1.000000e+00 : f32
      %42 = vector.broadcast %cst_24 : f32 to vector<2x128xf32>
      %43 = arith.divf %42, %41 : vector<2x128xf32>
      %44 = arith.mulf %38, %43 : vector<2x128xf32>
      %c0_25 = arith.constant 0 : index
      %c0_26 = arith.constant 0 : index
      %c0_27 = arith.constant 0 : index
      %45 = vector.load %arg6[%c0_25, %c0_26, %c0_27] : memref<2x2x128xf32, #tpu.memory_space<vmem>>, vector<1x2x128xf32>
      %46 = vector.shape_cast %45 : vector<1x2x128xf32> to vector<2x128xf32>
      %47 = vector.shape_cast %44 : vector<2x128xf32> to vector<1x2x128xf32>
      tpu.vector_store %arg6[%c0_25, %c0_26, %c0_27], %47 {strides = array<i32>} : memref<2x2x128xf32, #tpu.memory_space<vmem>>, vector<1x2x128xf32>,
      %48 = arith.mulf %40, %43 : vector<2x128xf32>
      %c1_28 = arith.constant 1 : index
      %c0_29 = arith.constant 0 : index
      %c0_30 = arith.constant 0 : index
      %49 = vector.load %arg6[%c1_28, %c0_29, %c0_30] : memref<2x2x128xf32, #tpu.memory_space<vmem>>, vector<1x2x128xf32>
      %50 = vector.shape_cast %49 : vector<1x2x128xf32> to vector<2x128xf32>
      %51 = vector.shape_cast %48 : vector<2x128xf32> to vector<1x2x128xf32>
      tpu.vector_store %arg6[%c1_28, %c0_29, %c0_30], %51 {strides = array<i32>} : memref<2x2x128xf32, #tpu.memory_space<vmem>>, vector<1x2x128xf32>,
    } else {
    }
    return
  }
  func.func @transform_0(%arg0: i32, %arg1: i32) -> (i32, i32, i32) {
    %c0_i32 = arith.constant 0 : i32
    %c0_i32_0 = arith.constant 0 : i32
    return %arg0, %c0_i32, %arg1 : i32, i32, i32
  }
  func.func @transform_1(%arg0: i32, %arg1: i32) -> (i32, i32) {
    %c0_i32 = arith.constant 0 : i32
    %c0_i32_0 = arith.constant 0 : i32
    %c0_i32_1 = arith.constant 0 : i32
    return %c0_i32, %c0_i32_0 : i32, i32
  }
  func.func @transform_2(%arg0: i32, %arg1: i32) -> (i32, i32, i32) {
    %c0_i32 = arith.constant 0 : i32
    %c0_i32_0 = arith.constant 0 : i32
    %c0_i32_1 = arith.constant 0 : i32
    %c0_i32_2 = arith.constant 0 : i32
    return %c0_i32, %c0_i32_0, %c0_i32_1 : i32, i32, i32
  }
  func.func @transform_3(%arg0: i32, %arg1: i32) -> (i32, i32) {
    %c0_i32 = arith.constant 0 : i32
    %c0_i32_0 = arith.constant 0 : i32
    %c0_i32_1 = arith.constant 0 : i32
    return %c0_i32, %c0_i32_0 : i32, i32
  }
  func.func @transform_4(%arg0: i32, %arg1: i32) -> (i32, i32, i32) {
    %c0_i32 = arith.constant 0 : i32
    %c0_i32_0 = arith.constant 0 : i32
    %c0_i32_1 = arith.constant 0 : i32
    return %c0_i32, %arg0, %c0_i32_0 : i32, i32, i32
  }
}

</mosaic_0001>

<bundles_post_ra>
// kernel: tpu_custom_call.1
= control target key start
LH: loop header
LB: loop body
LE: loop exit
PB: predicated region body
PF: predicated region fallthrough
CT: control target
= control target key end

     0   :  { %9 = vsyncpa [#allocation4], 0  ;;  %s878_s0 = inlined_call_operand.hbm [shape: f32[2,4,256], index: 0, kind: input, shape index: {}]   ;;  %s879_s1 = inlined_call_operand.vmem [shape: f32[8,4], index: 1, kind: input, shape index: {}]   ;;  %s880_s2 = inlined_call_operand.hbm [shape: f32[2,8,128], index: 2, kind: input, shape index: {}]   ;;  %s881_s3 = inlined_call_operand.vmem [shape: f32[2,128], index: 3, kind: input, shape index: {}]   ;;  %s882_s4 = inlined_call_operand.hbm [shape: f32[2,2,128], index: 4, kind: output, shape index: {}]  }
   0x1   :  { %11 = vsyncpa [#allocation4 + $0x1], 0 }
   0x2   :  { %12 = vsyncpa [#allocation7], 0 }
   0x3   :  { %13 = vsyncpa [#allocation5], 0  ;;  %s750_s15 = smov 0   ;;  %s752_s16 = smov 0  }
   0x4   :  { %s754_s17 = smov 0   ;;  %s756_s18 = smov 0  }
   0x5   :  { %s758_s19 = smov 0   ;;  %s760_s20 = smov 0  }
   0x6 LB: > { %s883_s21 = sadd.s32 4294967295, %s714_s20   ;;  %p53_p0 = scmp.ne.s32.totalorder %s698_s16, %s694_s15  ;;  %s714_s20 = sphi %s760_s20, %s19_s20   ;;  %s710_s19 = sphi %s758_s19, %s893_s19   ;;  %s706_s18 = sphi %s756_s18, %s892_s18   ;;  %s702_s17 = sphi %s754_s17, %s891_s17   ;;  %s698_s16 = sphi %s752_s16, %s890_s16   ;;  %s694_s15 = sphi %s750_s15, %s889_s15  }
   0x7   : > { %p782_p1 = scmp.eq.s32.totalorder %s883_s21, 0  ;;  %p466_p2 = scmp.ge.s32.totalorder %s714_s20, 1 }
   0x8   : > { %p153_p3 = scmp.lt.s32.totalorder %s714_s20, 3  ;;  %s167_s26 = sshll.u32 %s880_s2, 4  ;;  %s168_s26 = int_to_ptr.hbm [resolvable:$true] %s167_s26 }
   0x9   : > { %p790_p4 = por %p782_p1, %p53_p0  ;;  %s716_s28 = smov [#allocation6]  }
   0xa   : > { %p797_p5 = pnand %p466_p2, %p153_p3  ;;  %s169_s29 = sshll.u32 %s716_s28, 4  ;;  %s170_s29 = int_to_ptr.vmem [resolvable:$true] %s169_s29 }
   0xb   : > { %s717_s30 = smov 128   ;;  %s718_s5 = smov 8  }
   0xc   : > { %p492_p6 = pneg %p797_p5  ;;  %s28_s6 = sadd.s32 1, %s710_s19 }
   0xd   : > { %p29_p8 = scmp.ge.s32.totalorder %s28_s6, 2  ;;  %s40_s7 = sadd.s32 1, %s702_s17 }
   0xe   : > { %p493_p7 = pnand %p492_p6, %p782_p1  ;;  %p47_p9 = scmp.ne.s32.totalorder %s702_s17, %s698_s16 }
   0xf   : > { %p48_p10 = scmp.eq.s32.totalorder %s714_s20, 0  ;;  %s895_s6 = smov (%p29_p8, %s28_s6), 0 }
  0x10   : > { %495 = dma.hbm_to_vmem [thread:$0]  (!%p493_p7), %s168_s26, 256, %s170_s29, [#allocation7], %s717_s30, %s717_s30, %s718_s5  }
  0x11   : > { %p814_p11 = por %p48_p10, %p47_p9  ;;  %p501_p12 = scmp.lt.s32.totalorder %s714_s20, 2 }
  0x12   : > { %s36_s9 = ssub.s32 %s710_s19, %s895_s6  ;;  %s186_s10 = sand.u32 1, %s702_s17  }
  0x13   : > { %p38_p13 = scmp.eq.s32.totalorder %s36_s9, 0  ;;  %s469_s11 = sshll.u32 %s186_s10, 3 }
  0x14   : > { %s470_s12 = sshll.u32 %s710_s19, 2  ;;  %s190_s26 = scalar_lea.vmem [#allocation3], %s469_s11 }
  0x15   : > { %s824_s13 = scalar_select %p38_p13, %s702_s17, %s40_s7  }
  0x16   : > { %s197_s24 = scalar_lea.hbm %s878_s0, %s470_s12  ;;  %s200_s28 = sshll.u32 %s190_s26, 4  ;;  %s201_s28 = int_to_ptr.vmem [resolvable:$true] %s200_s28 }
  0x17   : > { %s198_s25 = sshll.u32 %s197_s24, 4  ;;  %p497_p0 = pnand %p501_p12, %p814_p11  ;;  %s199_s25 = int_to_ptr.hbm [resolvable:$true] %s198_s25 }
  0x18   : > { %s187_s29 = scalar_lea.sflag [#allocation4], %s186_s10  ;;  %s719_s5 = smov 64  }
  0x19   : > { %s720_s21 = smov 4   ;;  %212 = sbr.rel (%p797_p5) target bundleno = 489 (0x1e9), region = 36 }
  0x1a   : > { %499 = dma.hbm_to_vmem [thread:$0]  (!%p497_p0), %s199_s25, 128, %s201_s28, %s187_s29, %s717_s30, %s719_s5, %s720_s21  }
  0x1b   : > { %s214_s7 = sand.u32 (!%p797_p5), 1, %s698_s16  }
  0x1c   : > { %s472_s9 = sshll.u32 (!%p797_p5), %s214_s7, 3  ;;  %s215_s12 = scalar_lea.sflag (!%p797_p5), [#allocation4], %s214_s7 }
  0x1d   : > { %s218_s11 = scalar_lea.vmem (!%p797_p5), [#allocation3], %s472_s9 }
  0x1e   : > { %681 = dma.done.wait (%p790_p4), %s215_s12, 128  }
  0x1f   : > { %683 = vsyncadd (%p790_p4), %s215_s12, 4294967168 }
  0x20   : > { %685 = dma.done.wait (%p782_p1), [#allocation7], 256  }
  0x21   : > { %687 = vsyncadd (%p782_p1), [#allocation7], 4294967040  ;;  %p474_p2 = scmp.ne.s32.totalorder %s706_s18, 0 }
  0x23   : > { %248 = sbr.rel (%p474_p2) target bundleno = 42 (0x2a), region = 48 }
  0x28   : > { %vm249_vm0 = vcmask 25600   ;;  %v721_v0 = vmov 0.0  }
  0x29   : > { %250 = vst.msk [vmem:[#allocation2] sm:$0x3] %vm249_vm0, %v721_v0 }
  0x2a PF: > { %v251_v1 = vld [vmem:[%s218_s11] sm:$0xf]  ;;  %vm254_vm1 = vcmask 1043456   ;;  %v252_v3 = vld [vmem:[%s218_s11 + $0x4] sm:$0xf]  ;;  %v263_v6 = vlaneseq  ;;  %vm267_vm2 = vcmask 1041409  }
  0x2b   : > { %v255_v2 = vsel %vm254_vm1, %v251_v1, 0.0  ;;  %v258_v4 = vsel %vm254_vm1, %v252_v3, 0.0  ;;  %vm271_vm3 = vcmask 25600   ;;  %p475_p1 = scmp.ne.s32.totalorder %s706_s18, 1 }
  0x2c   : > { %256 = vadd.xlane.f32.xlu0 %v255_v2  ;;  %v264_v7 = vand.u32 127, %v263_v6 }
  0x30   : > { %v253_v10 = vld [vmem:[#allocation2] sm:$0x3] }
  0x34   : > { %259 = vadd.xlane.f32.xlu0 %v258_v4 }
  0x9f   : > { %v257_v5 = vpop.xlane.xlu0 %256 }
  0xa0   : > { %v265_v9 = vperm.slane %v257_v5, %v264_v7 }
  0xa7   : > { %v260_v8 = vpop.xlane.xlu0 %259 }
  0xa8   : > { %v266_v11 = vperm.slane %v260_v8, %v264_v7 }
  0xa9   : > { %276 = sbr.rel (%p475_p1) target bundleno = 482 (0x1e2), region = 52 }
  0xaa   : > { %v268_v12 = vsel %vm267_vm2, %v266_v11, %v265_v9 }
  0xab   : > { %v270_v13 = vadd.f32 %v268_v12, %v253_v10 }
  0xad   : > { %272 = vst.msk [vmem:[#allocation2] sm:$0x3] %vm271_vm3, %v270_v13 }
  0xae   : > { %v279_v16 = vld [vmem:[%s879_s1] sm:$0xff]  ;;  %vm288_vm4 = vcmask 31744   ;;  %v298_v24 = vld [vmem:[#allocation6] sm:$0xff]  ;;  %vm305_vm5 = vcmask 64512  }
  0xaf   : > { %v329_v25 = vld [vmem:[#allocation6 + $0x8] sm:$0xff]  ;;  %323 = vmatpush.msra.mxu0 %v298_v24 }
  0xb0   : > { %346 = vmatpush.msra.mxu1 %v329_v25  ;;  %v297_v33 = vld [vmem:[%s881_s3] sm:$0x3] }
  0xb1   : > { %v299_v34 = vperm.slane %v297_v33, 0  ;;  %v330_v35 = vperm.slane %v297_v33, 1 }
  0xb4   : > { %v277_v14 = vld [vmem:[#allocation2] sm:$0x3] }
  0xb5   : > { %v278_v15 = vmul.f32 0.00390625, %v277_v14 }
  0xb7   : > { %v282_v17 = vperm.slane %v278_v15, 0  ;;  %v281_v18 = vrot.slane %v278_v15, 1 }
  0xb9   : > { %v286_v19 = vmul.f32 %v282_v17, %v279_v16  ;;  %v283_v20 = vperm.slane %v281_v18, 0 }
  0xbb   : > { %v289_v21 = vsel %vm288_vm4, %v286_v19, 0.0  ;;  %v287_v22 = vmul.f32 %v283_v20, %v279_v16 }
  0xbc   : > { %290 = vadd.xlane.f32.xlu0 %v289_v21 }
  0xbd   : > { %v292_v23 = vsel %vm288_vm4, %v287_v22, 0.0 }
  0xc4   : > { %293 = vadd.xlane.f32.xlu0 %v292_v23 }
 0x12f   : > { %v291_v26 = vpop.xlane.xlu0 %290 }
 0x130   : > { %v295_v27 = vmax.f32 %v291_v26, 0.0 }
 0x132   : > { %v302_v30 = vperm.slane %v295_v27, %v264_v7 }
 0x137   : > { %v294_v28 = vpop.xlane.xlu0 %293 }
 0x138   : > { %v296_v29 = vmax.f32 %v294_v28, 0.0 }
 0x13a   : > { %v303_v31 = vperm.slane %v296_v29, %v264_v7 }
 0x13c   : > { %v304_v32 = vsel %vm267_vm2, %v303_v31, %v302_v30 }
 0x13d   : > { %476 = vmatmul.msk.f32.vlgmr.msra.gmra.mxu0 %vm305_vm5, %v304_v32  ;;  %477 = vmatmul.msk.f32.vlgmr.msra.gmra.mxu1 %vm305_vm5, %v304_v32 }
 0x1ba   : > { %v325_v36 = vpop.f32.mrf.mxu0  ;;  %v348_v37 = vpop.f32.mrf.mxu1 }
 0x1bb   : > { %v326_v38 = vadd.f32 %v325_v36, %v299_v34  ;;  %v349_v39 = vadd.f32 %v348_v37, %v330_v35 }
 0x1bd   : > { %v351_v40 = vmax.f32 %v326_v38, %v349_v39 }
 0x1bf   : > { %v352_v41 = vsub.f32 %v326_v38, %v351_v40  ;;  %v355_v42 = vsub.f32 %v349_v39, %v351_v40 }
 0x1c1   : > { %v353_v43 = vmul.f32 1.442695, %v352_v41  ;;  %v356_v44 = vmul.f32 1.442695, %v355_v42 }
 0x1c3   : > { %562 = vpow2.f32 %v353_v43 }
 0x1c4   : > { %564 = vpow2.f32 %v356_v44 }
 0x1c9   : > { %v563_v45 = vpop.eup %562 }
 0x1ca   : > { %v565_v46 = vpop.eup %564 }
 0x1cb   : > { %v358_v47 = vadd.f32 %v565_v46, %v563_v45 }
 0x1cd   : > { %566 = vrcp.f32 %v358_v47  ;;  %v370_v51 = vand.u32 2147483648, %v358_v47  ;;  %v368_v53 = vand.u32 2147483647, %v358_v47  ;;  %vm364_vm7 = vweird.f32 %v358_v47 }
 0x1cf   : > { %v371_v55 = vor.u32 1.1754944e-38, %v370_v51  ;;  %vm369_vm9 = vcmp.eq.f32.partialorder %v368_v53, 8.507059e+37 }
 0x1d3   : > { %v567_v48 = vpop.eup %566 }
 0x1d4   : > { %v360_v49 = vmul.f32 %v567_v48, %v358_v47  ;;  %vm365_vm6 = vweird.f32 %v567_v48 }
 0x1d5   : > { %vm366_vm8 = vmor %vm364_vm7, %vm365_vm6 }
 0x1d6   : > { %v361_v50 = vsub.f32 1.0, %v360_v49 }
 0x1d8   : > { %v362_v52 = vmul.f32 %v567_v48, %v361_v50 }
 0x1da   : > { %v363_v54 = vadd.f32 %v567_v48, %v362_v52 }
 0x1dc   : > { %v367_v56 = vsel %vm366_vm8, %v567_v48, %v363_v54 }
 0x1dd   : > { %v372_v57 = vsel %vm369_vm9, %v371_v55, %v367_v56 }
 0x1de   : > { %v374_v58 = vmul.f32 %v563_v45, %v372_v57  ;;  %v376_v59 = vmul.f32 %v565_v46, %v372_v57 }
 0x1e0   : > { %375 = vst [vmem:[#allocation8] sm:$0x3] %v374_v58 }
 0x1e1   : > { %378 = vst [vmem:[#allocation8 + $0x2] sm:$0x3] %v376_v59 }
 0x1e2 PF: > { %s888_s27 = sadd.s32 4294967295, %s714_s20   ;;  %s388_s10 = sshll.u32 %s882_s4, 4  ;;  %s389_s10 = int_to_ptr.hbm [resolvable:$true] %s388_s10 }
 0x1e3   : > { %p503_p3 = scmp.eq.s32.totalorder %s888_s27, 1  ;;  %s722_s14 = smov [#allocation8]  }
 0x1e4   : > { %s386_s15 = sshll.u32 %s722_s14, 4  ;;  %s723_s24 = smov 32   ;;  %s387_s15 = int_to_ptr.vmem [resolvable:$true] %s386_s15 }
 0x1e5   : > { %s724_s25 = smov 2  }
 0x1e6   : > { %489 = dma.vmem_to_hbm [thread:$0]  (%p503_p3), %s387_s15, 64, %s389_s10, [#allocation5], %s723_s24, %s723_s24, %s724_s25  }
 0x1e7   : > { %689 = dma.done.wait (%p503_p3), [#allocation5], 64  }
 0x1e8   : > { %691 = vsyncadd (%p503_p3), [#allocation5], 4294967232 }
 0x1e9 PF: > { %s19_s20 = sadd.s32 1, %s714_s20   ;;  %s889_s15 = smov %s698_s16 }
 0x1ea   : > { %p16_p4 = scmp.ge.s32.totalorder %s19_s20, 4   ;;  %s890_s16 = smov %s702_s17 }
 0x1eb   : > { %s891_s17 = smov %s824_s13  ;;  %s892_s18 = smov %s710_s19 }
 0x1ec   : > { %s893_s19 = smov %s895_s6  ;;  %18 = sbr.rel (!%p16_p4) target bundleno = 6 (0x6), region = 88 }
 0x1f1   :  { %405 = vsyncpa [#allocation4], 1 }
 0x1f2   :  { %407 = vsyncpa [#allocation4 + $0x1], 1 }
 0x1f3   :  { %408 = vsyncpa [#allocation7], 1 }
 0x1f4   :  { %409 = vsyncpa [#allocation5], 1 }
 0x1f5   :  { %411 = vsyncpa [#allocation5 + $0x1], 1 }

</bundles_post_ra>
